<compile_context>
chip_gen: v6e
topology: v6e:2x2x1
jax: 0.10.0
libtpu: 0.0.40
codegen_flags: <defaults>
</compile_context>

<pallas_src>
import functools

import jax
import jax.numpy as jnp
from jax.experimental import pallas as pl
from jax.experimental.pallas import tpu as pltpu


def _residual_kernel(*refs, eps, has_mask):
    if has_mask:
        x_ref, wt_ref, b_ref, g_ref, beta_ref, mask_ref, o_ref = refs
    else:
        x_ref, wt_ref, b_ref, g_ref, beta_ref, o_ref = refs
        mask_ref = None

    # --- sublayer: y = x @ W^T + b ---
    # W is pre-transposed in the wrapper, so this is a plain MXU dot with no
    # in-kernel transpose.  Operands stay in their storage dtype (bf16 native
    # MXU path when inputs are bf16); accumulation is f32.
    x_in = x_ref[...]
    y = jnp.dot(x_in, wt_ref[...], preferred_element_type=jnp.float32)
    y = y + b_ref[...].astype(jnp.float32)

    # --- dropout (inverted dropout; mask already holds 0 or 1/(1-p)) ---
    if has_mask:
        y = y * mask_ref[...]

    # --- residual add (f32 epilogue) ---
    z = x_in.astype(jnp.float32) + y

    # --- LayerNorm over last axis: one-pass statistics ---
    d = z.shape[-1]
    inv_d = 1.0 / d
    s1 = jnp.sum(z, axis=-1, keepdims=True)
    s2 = jnp.sum(z * z, axis=-1, keepdims=True)
    mean = s1 * inv_d
    var = jnp.maximum(s2 * inv_d - mean * mean, 0.0)
    zhat = (z - mean) * jax.lax.rsqrt(var + eps)
    out = zhat * g_ref[...].astype(jnp.float32) + beta_ref[...].astype(jnp.float32)
    o_ref[...] = out.astype(o_ref.dtype)


def _pick_tile_rows(rows):
    # Largest "nice" divisor: multiple of 8 (sublane), capped so the x/out
    # tiles stay a few MiB and the grid has several steps to pipeline/shard.
    for t in (512, 256, 128, 64, 32, 16, 8):
        if rows % t == 0:
            return t
    return rows  # degenerate small shapes: single full-row tile


def residual_forward(x, w, b, gamma, beta, *, p=0.1, training=False,
                     eps=1e-5, rng_key=None, tile_rows=None):
    """x: (B, S, D); w: (D, D) [Linear weight, PyTorch layout]; b/gamma/beta: (D,)."""
    B, S, D = x.shape
    rows = B * S
    if tile_rows is None:
        tile_rows = _pick_tile_rows(rows)
    assert rows % tile_rows == 0, (rows, tile_rows)
    # TODO(synk): for D not a multiple of 128 (e.g. the demo D=32) the output
    # stores are lane-masked; production shapes should use D % 128 == 0.

    x2 = x.reshape(rows, D)
    wt = jnp.transpose(w)            # pre-transpose ONCE in XLA, not per grid step
    b2 = b.reshape(1, D)
    g2 = gamma.reshape(1, D)
    beta2 = beta.reshape(1, D)

    has_mask = bool(training) and p > 0.0
    operands = [x2, wt, b2, g2, beta2]
    in_specs = [
        pl.BlockSpec((tile_rows, D), lambda i: (i, 0)),   # x tile
        pl.BlockSpec((D, D),         lambda i: (0, 0)),   # W^T (grid-invariant)
        pl.BlockSpec((1, D),         lambda i: (0, 0)),   # bias
        pl.BlockSpec((1, D),         lambda i: (0, 0)),   # gamma
        pl.BlockSpec((1, D),         lambda i: (0, 0)),   # beta
    ]
    if has_mask:
        if rng_key is None:
            rng_key = jax.random.PRNGKey(0)
        keep = jax.random.bernoulli(rng_key, 1.0 - p, (rows, D))
        mask = keep.astype(jnp.float32) * (1.0 / (1.0 - p))
        operands.append(mask)
        in_specs.append(pl.BlockSpec((tile_rows, D), lambda i: (i, 0)))

    kernel = functools.partial(_residual_kernel, eps=eps, has_mask=has_mask)

    # VMEM budget: double-buffered x/out(/mask) tiles + resident W^T + small
    # per-row params, with headroom.
    itm = x.dtype.itemsize
    tile_io = tile_rows * D * itm * 2 + tile_rows * D * itm * 2
    if has_mask:
        tile_io += tile_rows * D * 4 * 2
    w_bytes = D * D * w.dtype.itemsize * 2
    vmem_limit = int(max(tile_io + w_bytes + 6 * D * 4 + (2 << 20), 8 << 20))

    grid = (rows // tile_rows,)
    out = pl.pallas_call(
        kernel,
        out_shape=jax.ShapeDtypeStruct((rows, D), x.dtype),
        grid_spec=pltpu.PrefetchScalarGridSpec(
            num_scalar_prefetch=0,
            grid=grid,
            in_specs=in_specs,
            out_specs=pl.BlockSpec((tile_rows, D), lambda i: (i, 0)),
        ),
        compiler_params=pltpu.CompilerParams(
            dimension_semantics=("parallel",),   # row tiles fully independent
            vmem_limit_bytes=vmem_limit,
        ),
    )(*operands)
    return out.reshape(B, S, D)


def residual_reference(x, w, b, gamma, beta, eps=1e-5):
    """Pure-JAX reference (eval mode: dropout = identity)."""
    y = jnp.einsum("bsd,ed->bse", x, w) + b
    z = x + y
    mean = jnp.mean(z, axis=-1, keepdims=True)
    var = jnp.mean((z - mean) ** 2, axis=-1, keepdims=True)
    zhat = (z - mean) / jnp.sqrt(var + eps)
    return zhat * gamma + beta


if __name__ == "__main__":
    B, S, D = 2, 8, 32  # batch=2, seq=8, hidden(dimension)=32

    key = jax.random.PRNGKey(0)
    kx, kw, kb, kd = jax.random.split(key, 4)

    x = jax.random.normal(kx, (B, S, D), dtype=jnp.float32)
    # Sublayer = Linear(D, D): deterministic synthetic init (PyTorch weight layout).
    w = jax.random.normal(kw, (D, D), dtype=jnp.float32) * (1.0 / jnp.sqrt(D))
    b = jax.random.normal(kb, (D,), dtype=jnp.float32) * 0.01
    # LayerNorm(dimension) default init: weight=1, bias=0.
    gamma = jnp.ones((D,), dtype=jnp.float32)
    beta = jnp.zeros((D,), dtype=jnp.float32)

    # Eval-mode run (dropout identity) — checkable against the pure-JAX reference.
    out = residual_forward(x, w, b, gamma, beta, p=0.1, training=False)
    out = jax.block_until_ready(out)

    ref = residual_reference(x, w, b, gamma, beta)
    assert out.shape == (B, S, D)
    assert jnp.allclose(out, ref, atol=1e-4, rtol=1e-4), "mismatch vs reference"

    # Training-mode (stochastic inverted dropout) smoke test.
    out_train = jax.block_until_ready(
        residual_forward(x, w, b, gamma, beta, p=0.1, training=True, rng_key=kd))
    assert out_train.shape == (B, S, D)
    assert bool(jnp.all(jnp.isfinite(out_train)))

    print("KERNEL_OK")
</pallas_src>

<mosaic_0001>
module attributes {stable_mosaic.version = 11 : i64} {
  func.func @_residual_kernel(%arg0: i32, %arg1: memref<16x32xf32, #tpu.memory_space<vmem>>, %arg2: memref<32x32xf32, #tpu.memory_space<vmem>>, %arg3: memref<1x32xf32, #tpu.memory_space<vmem>>, %arg4: memref<1x32xf32, #tpu.memory_space<vmem>>, %arg5: memref<1x32xf32, #tpu.memory_space<vmem>>, %arg6: memref<16x32xf32, #tpu.memory_space<vmem>>) attributes {dimension_semantics = [#tpu.dimension_semantics<parallel>], iteration_bounds = array<i64: 1>, scalar_prefetch = 0 : i64, scratch_operands = 0 : i64, tpu.core_type = #tpu.core_type<tc>, window_params = [{transform_indices = @transform_0, window_bounds = array<i64: 16, 32>}, {pipeline_mode = #tpu.pipeline_mode<synchronous>, transform_indices = @transform_1, window_bounds = array<i64: 32, 32>}, {pipeline_mode = #tpu.pipeline_mode<synchronous>, transform_indices = @transform_2, window_bounds = array<i64: 1, 32>}, {pipeline_mode = #tpu.pipeline_mode<synchronous>, transform_indices = @transform_3, window_bounds = array<i64: 1, 32>}, {pipeline_mode = #tpu.pipeline_mode<synchronous>, transform_indices = @transform_4, window_bounds = array<i64: 1, 32>}, {transform_indices = @transform_5, window_bounds = array<i64: 16, 32>}]} {
    %c0 = arith.constant 0 : index
    %c0_0 = arith.constant 0 : index
    %0 = vector.load %arg1[%c0, %c0_0] : memref<16x32xf32, #tpu.memory_space<vmem>>, vector<16x32xf32>
    %c0_1 = arith.constant 0 : index
    %c0_2 = arith.constant 0 : index
    %1 = vector.load %arg2[%c0_1, %c0_2] : memref<32x32xf32, #tpu.memory_space<vmem>>, vector<32x32xf32>
    %cst = arith.constant dense<0.000000e+00> : vector<16x32xf32>
    %2 = tpu.matmul %0, %1, %cst {dimension_numbers = #tpu.dot_dimension_numbers<[1], [0], [0], [1], [0, 0, 1, 1], [], []>} : vector<16x32xf32>, vector<32x32xf32>, vector<16x32xf32> -> vector<16x32xf32>
    %c0_3 = arith.constant 0 : index
    %c0_4 = arith.constant 0 : index
    %3 = vector.load %arg3[%c0_3, %c0_4] : memref<1x32xf32, #tpu.memory_space<vmem>>, vector<1x32xf32>
    %4 = vector.broadcast %3 : vector<1x32xf32> to vector<16x32xf32>
    %5 = arith.addf %2, %4 : vector<16x32xf32>
    %6 = arith.addf %0, %5 : vector<16x32xf32>
    %cst_5 = arith.constant dense<0.000000e+00> : vector<16xf32>
    %7 = vector.multi_reduction <add>, %6, %cst_5 [1] : vector<16x32xf32> to vector<16xf32>
    %8 = vector.shape_cast %7 : vector<16xf32> to vector<16x1xf32>
    %9 = arith.mulf %6, %6 : vector<16x32xf32>
    %cst_6 = arith.constant dense<0.000000e+00> : vector<16xf32>
    %10 = vector.multi_reduction <add>, %9, %cst_6 [1] : vector<16x32xf32> to vector<16xf32>
    %11 = vector.shape_cast %10 : vector<16xf32> to vector<16x1xf32>
    %cst_7 = arith.constant 3.125000e-02 : f32
    %12 = vector.broadcast %cst_7 : f32 to vector<16x1xf32>
    %13 = arith.mulf %8, %12 : vector<16x1xf32>
    %cst_8 = arith.constant 3.125000e-02 : f32
    %14 = vector.broadcast %cst_8 : f32 to vector<16x1xf32>
    %15 = arith.mulf %11, %14 : vector<16x1xf32>
    %16 = arith.mulf %13, %13 : vector<16x1xf32>
    %17 = arith.subf %15, %16 : vector<16x1xf32>
    %cst_9 = arith.constant 0.000000e+00 : f32
    %18 = vector.broadcast %cst_9 : f32 to vector<16x1xf32>
    %19 = arith.maximumf %17, %18 : vector<16x1xf32>
    %20 = vector.broadcast %13 : vector<16x1xf32> to vector<16x32xf32>
    %21 = arith.subf %6, %20 : vector<16x32xf32>
    %cst_10 = arith.constant 9.99999974E-6 : f32
    %22 = vector.broadcast %cst_10 : f32 to vector<16x1xf32>
    %23 = arith.addf %19, %22 : vector<16x1xf32>
    %24 = math.rsqrt %23 : vector<16x1xf32>
    %25 = vector.broadcast %24 : vector<16x1xf32> to vector<16x32xf32>
    %26 = arith.mulf %21, %25 : vector<16x32xf32>
    %c0_11 = arith.constant 0 : index
    %c0_12 = arith.constant 0 : index
    %27 = vector.load %arg4[%c0_11, %c0_12] : memref<1x32xf32, #tpu.memory_space<vmem>>, vector<1x32xf32>
    %28 = vector.broadcast %27 : vector<1x32xf32> to vector<16x32xf32>
    %29 = arith.mulf %26, %28 : vector<16x32xf32>
    %c0_13 = arith.constant 0 : index
    %c0_14 = arith.constant 0 : index
    %30 = vector.load %arg5[%c0_13, %c0_14] : memref<1x32xf32, #tpu.memory_space<vmem>>, vector<1x32xf32>
    %31 = vector.broadcast %30 : vector<1x32xf32> to vector<16x32xf32>
    %32 = arith.addf %29, %31 : vector<16x32xf32>
    %c0_15 = arith.constant 0 : index
    %c0_16 = arith.constant 0 : index
    %33 = vector.load %arg6[%c0_15, %c0_16] : memref<16x32xf32, #tpu.memory_space<vmem>>, vector<16x32xf32>
    tpu.vector_store %arg6[%c0_15, %c0_16], %32 {strides = array<i32>} : memref<16x32xf32, #tpu.memory_space<vmem>>, vector<16x32xf32>,
    return
  }
  func.func @transform_0(%arg0: i32) -> (i32, i32) {
    %c0_i32 = arith.constant 0 : i32
    %c0_i32_0 = arith.constant 0 : i32
    return %arg0, %c0_i32 : i32, i32
  }
  func.func @transform_1(%arg0: i32) -> (i32, i32) {
    %c0_i32 = arith.constant 0 : i32
    %c0_i32_0 = arith.constant 0 : i32
    %c0_i32_1 = arith.constant 0 : i32
    return %c0_i32, %c0_i32_0 : i32, i32
  }
  func.func @transform_2(%arg0: i32) -> (i32, i32) {
    %c0_i32 = arith.constant 0 : i32
    %c0_i32_0 = arith.constant 0 : i32
    %c0_i32_1 = arith.constant 0 : i32
    return %c0_i32, %c0_i32_0 : i32, i32
  }
  func.func @transform_3(%arg0: i32) -> (i32, i32) {
    %c0_i32 = arith.constant 0 : i32
    %c0_i32_0 = arith.constant 0 : i32
    %c0_i32_1 = arith.constant 0 : i32
    return %c0_i32, %c0_i32_0 : i32, i32
  }
  func.func @transform_4(%arg0: i32) -> (i32, i32) {
    %c0_i32 = arith.constant 0 : i32
    %c0_i32_0 = arith.constant 0 : i32
    %c0_i32_1 = arith.constant 0 : i32
    return %c0_i32, %c0_i32_0 : i32, i32
  }
  func.func @transform_5(%arg0: i32) -> (i32, i32) {
    %c0_i32 = arith.constant 0 : i32
    %c0_i32_0 = arith.constant 0 : i32
    return %arg0, %c0_i32 : i32, i32
  }
}

</mosaic_0001>

<bundles_post_ra>
// kernel: tpu_custom_call.1
= control target key start
LH: loop header
LB: loop body
LE: loop exit
PB: predicated region body
PF: predicated region fallthrough
CT: control target
= control target key end

     0   :  { %10 = vsyncpa [#allocation3], 0  ;;  %s383_s0 = inlined_call_operand.hbm [shape: f32[16,32], index: 0, kind: input, shape index: {}]   ;;  %s384_s1 = inlined_call_operand.hbm [shape: f32[32,32], index: 1, kind: input, shape index: {}]   ;;  %s385_s2 = inlined_call_operand.vmem [shape: f32[1,32], index: 2, kind: input, shape index: {}]   ;;  %s386_s3 = inlined_call_operand.vmem [shape: f32[1,32], index: 3, kind: input, shape index: {}]   ;;  %s387_s4 = inlined_call_operand.vmem [shape: f32[1,32], index: 4, kind: input, shape index: {}]   ;;  %s388_s5 = inlined_call_operand.hbm [shape: f32[16,32], index: 5, kind: output, shape index: {}]  }
   0x1   :  { %11 = vsyncpa [#allocation6], 0 }
   0x2   :  { %12 = vsyncpa [#allocation4], 0  ;;  %s313_s18 = smov [#allocation2]  }
   0x3   :  { %s18_s19 = sshll.u32 %s313_s18, 4  ;;  %s19_s19 = int_to_ptr.vmem [resolvable:$true] %s18_s19 }
   0x4   :  { %s255_s20 = scalar_lea.vmem %s19_s19, 256  ;;  %p260_p1 = scmp.lt.s32.totalorder %s19_s19, %s19_s19 }
   0x5   :  { %p256_p0 = scmp.ne.s32.totalorder %s19_s19, %s255_s20  ;;  %p261_p2 = scmp.lt.s32.totalorder %s255_s20, %s255_s20 }
   0x7   :  { %p262_p3 = por %p261_p2, %p260_p1 }
   0x9   :  { %p263_p4 = pnand %p262_p3, %p256_p0 }
   0xb   :  { %266 = shalt.err (!%p263_p4)
}
   0xc   :  { %s314_s21 = smov 128   ;;  %s315_s22 = smov 8  }
   0xd   :  { %24 = dma.hbm_to_vmem [thread:$0]  %s383_s0, 256, %s19_s19, [#allocation3], %s314_s21, %s314_s21, %s315_s22  }
   0xe   :  { %s316_s25 = smov [#allocation5]  }
   0xf   :  { %s30_s26 = sshll.u32 %s316_s25, 4  ;;  %s31_s26 = int_to_ptr.vmem [resolvable:$true] %s30_s26 }
  0x10   :  { %s275_s27 = scalar_lea.vmem %s31_s26, 512  ;;  %p280_p6 = scmp.lt.s32.totalorder %s31_s26, %s31_s26 }
  0x11   :  { %p276_p5 = scmp.ne.s32.totalorder %s31_s26, %s275_s27  ;;  %p281_p7 = scmp.lt.s32.totalorder %s275_s27, %s275_s27 }
  0x13   :  { %p282_p8 = por %p281_p7, %p280_p6 }
  0x15   :  { %p283_p9 = pnand %p282_p8, %p276_p5 }
  0x17   :  { %286 = shalt.err (!%p283_p9)
}
  0x18   :  { %36 = dma.hbm_to_vmem [thread:$0]  %s384_s1, 512, %s31_s26, [#allocation6], %s314_s21, %s314_s21, %s315_s22  }
  0x19   :  { %307 = dma.done.wait [#allocation3], 256  }
  0x1a   :  { %308 = vsyncadd [#allocation3], 4294967040 }
  0x1b   :  { %309 = dma.done.wait [#allocation6], 512  }
  0x1c   :  { %310 = vsyncadd [#allocation6], 4294966784  ;;  %vm62_vm0 = vcmask 261120   ;;  %v54_v0 = vld [vmem:[#allocation5 + $0x18] sm:$0xff]  ;;  %v53_v1 = vld [vmem:[#allocation5 + $0x10] sm:$0xff]  ;;  %s317_s8 = smov [#allocation7]  }
  0x1d   :  { %227 = vmatprep.subr.mxu0 %v54_v0  ;;  %v49_v2 = vld [vmem:[#allocation2] sm:$0xff]  ;;  %v52_v3 = vld [vmem:[#allocation5 + $0x8] sm:$0xff]  ;;  %v51_v4 = vld [vmem:[#allocation5] sm:$0xff]  ;;  %s203_s9 = sshll.u32 %s317_s8, 4  ;;  %s204_s9 = int_to_ptr.vmem [resolvable:$true] %s203_s9 }
  0x1e   :  { %228 = vmatpush3.msra.mxu0 %v54_v0  ;;  %235 = vmatprep.mubr.msk.f32.mxu0 %vm62_vm0, %v49_v2  ;;  %v50_v5 = vld [vmem:[#allocation2 + $0x8] sm:$0xff]  ;;  %v216_v6 = vld [vmem:[%s385_s2] ss:$0 sm:$0xff]  ;;  %p292_p11 = scmp.lt.s32.totalorder %s204_s9, %s204_s9 }
  0x1f   :  { %229 = vmatprep.subr.mxu0 %v53_v1  ;;  %v219_v37 = vld [vmem:[%s386_s3] ss:$0 sm:$0xff]  ;;  %s287_s3 = scalar_lea.vmem %s204_s9, 256 }
  0x20   :  { %230 = vmatpush3.msra.mxu0 %v53_v1  ;;  %v220_v39 = vld [vmem:[%s387_s4] ss:$0 sm:$0xff]  ;;  %p288_p10 = scmp.ne.s32.totalorder %s204_s9, %s287_s3  ;;  %p293_p12 = scmp.lt.s32.totalorder %s287_s3, %s287_s3 }
  0x21   :  { %231 = vmatprep.subr.mxu0 %v52_v3 }
  0x22   :  { %232 = vmatpush3.msra.mxu0 %v52_v3  ;;  %p294_p13 = por %p293_p12, %p292_p11 }
  0x23   :  { %233 = vmatprep.subr.mxu0 %v51_v4 }
  0x24   :  { %234 = vmatpush3.msra.mxu0 %v51_v4  ;;  %p295_p0 = pnand %p294_p13, %p288_p10 }
  0x25   :  { %236 = vmatmul.mubr.msk.f32.vlgmr.msra.gmra.mxu0 %vm62_vm0, %v50_v5 }
  0xe5   :  { %v237_v7 = vpop.f32.mrf.mxu0 }
  0xe6   :  { %v141_v8 = vadd.f32 %v237_v7, %v216_v6 }
  0xe7   :  { %v135_v9 = vpop.f32.mrf.mxu0 }
  0xe8   :  { %v136_v10 = vadd.f32 %v216_v6, %v135_v9  ;;  %v145_v11 = vadd.f32 %v141_v8, %v50_v5 }
  0xea   :  { %v144_v12 = vadd.f32 %v136_v10, %v49_v2  ;;  %v153_v16 = vmul.f32 %v145_v11, %v145_v11  ;;  %v149_v17 = vsel %vm62_vm0, %v145_v11, 0.0 }
  0xec   :  { %v146_v13 = vsel %vm62_vm0, %v144_v12, 0.0  ;;  %v152_v14 = vmul.f32 %v144_v12, %v144_v12  ;;  %v157_v18 = vsel %vm62_vm0, %v153_v16, 0.0 }
  0xed   :  { %147 = vadd.xlane.f32.xlu0 %v146_v13 }
  0xee   :  { %v154_v15 = vsel %vm62_vm0, %v152_v14, 0.0 }
  0xef   :  { %155 = vadd.xlane.f32.xlu1 %v154_v15 }
  0xf1   :  { %150 = vadd.xlane.f32.xlu0 %v149_v17 }
  0xf3   :  { %158 = vadd.xlane.f32.xlu1 %v157_v18 }
 0x176   :  { %v148_v19 = vpop.xlane.xlu0 %147 }
 0x177   :  { %v160_v20 = vmul.f32 0.03125, %v148_v19 }
 0x178   :  { %v156_v21 = vpop.xlane.xlu1 %155 }
 0x179   :  { %v164_v22 = vmul.f32 %v160_v20, %v160_v20  ;;  %v162_v23 = vmul.f32 0.03125, %v156_v21  ;;  %v170_v35 = vsub.f32 %v144_v12, %v160_v20 }
 0x17a   :  { %v151_v24 = vpop.xlane.xlu0 %150 }
 0x17b   :  { %v166_v25 = vsub.f32 %v162_v23, %v164_v22  ;;  %v161_v26 = vmul.f32 0.03125, %v151_v24 }
 0x17c   :  { %v159_v27 = vpop.xlane.xlu1 %158 }
 0x17d   :  { %v168_v28 = vmax.f32 %v166_v25, 0.0  ;;  %v165_v29 = vmul.f32 %v161_v26, %v161_v26  ;;  %v163_v30 = vmul.f32 0.03125, %v159_v27  ;;  %v171_v40 = vsub.f32 %v145_v11, %v161_v26 }
 0x17f   :  { %v172_v31 = vadd.f32 1e-05, %v168_v28  ;;  %v167_v32 = vsub.f32 %v163_v30, %v165_v29 }
 0x181   :  { %243 = vrsqrt.f32 %v172_v31  ;;  %v169_v33 = vmax.f32 %v167_v32, 0.0 }
 0x183   :  { %v173_v34 = vadd.f32 1e-05, %v169_v33 }
 0x185   :  { %245 = vrsqrt.f32 %v173_v34 }
 0x18e   :  { %v244_v36 = vpop.eup %243 }
 0x18f   :  { %v176_v38 = vmul.f32 %v244_v36, %v170_v35 }
 0x191   :  { %v185_v41 = vmul.f32 %v219_v37, %v176_v38 }
 0x192   :  { %v246_v42 = vpop.eup %245 }
 0x193   :  { %v177_v43 = vmul.f32 %v246_v42, %v171_v40  ;;  %v194_v44 = vadd.f32 %v220_v39, %v185_v41 }
 0x195   :  { %v186_v45 = vmul.f32 %v219_v37, %v177_v43  ;;  %196 = vst.msk [vmem:[#allocation7] sm:$0xff] %vm62_vm0, %v194_v44 }
 0x197   :  { %v195_v46 = vadd.f32 %v220_v39, %v186_v45 }
 0x199   :  { %197 = vst.msk [vmem:[#allocation7 + $0x8] sm:$0xff] %vm62_vm0, %v195_v46 }
 0x19a   :  { %298 = shalt.err (!%p295_p0)
}
 0x19b   :  { %209 = dma.vmem_to_hbm [thread:$0]  %s204_s9, 256, %s388_s5, [#allocation4], %s314_s21, %s314_s21, %s315_s22  }
 0x19c   :  { %311 = dma.done.wait [#allocation4], 256  }
 0x19d   :  { %312 = vsyncadd [#allocation4], 4294967040 }
 0x19e   :  { %213 = vsyncpa [#allocation3], 1 }
 0x19f   :  { %214 = vsyncpa [#allocation6], 1 }
 0x1a0   :  { %215 = vsyncpa [#allocation4], 1 }

</bundles_post_ra>
